<compile_context>
chip_gen: v5e
topology: v5e:2x2
jax: 0.10.0
libtpu: 0.0.40
codegen_flags: <defaults>
</compile_context>

<pallas_src>
import functools

import jax
import jax.numpy as jnp
from jax.experimental import pallas as pl
from jax.experimental.pallas import tpu as pltpu

HPAD = 128  # hidden dim padded 50 -> 128 (one full lane width)
OPAD = 8    # output padded 3 -> 8 (one sublane row; minimal HBM writeback)


def _round_up(x, m):
    return (x + m - 1) // m * m


def lorenz_mlp_kernel(y_ref, w1_ref, b1_ref, w2_ref, b2_ref, w3_ref, b3_ref, o_ref):
    """One batch tile of the fused MLP, entirely in VMEM.

        h1 = tanh(y @ W1 + b1)     # K=3 contraction -> 3 broadcasted VPU FMAs
        h2 = tanh(h1 @ W2 + b2)    # 128x128 bf16 MXU matmul, f32 accumulate
        o  = h2 @ W3 + b3          # 128x8   bf16 MXU matmul, f32 accumulate
    """
    y = y_ref[...]                               # (TB, 3) f32
    w1 = w1_ref[...]                             # (3, HPAD) f32

    # First layer: K=3 contraction as three broadcasted multiply-adds on the
    # VPU (the MXU would be ~empty for K=3 and only adds push/pop latency).
    pre1 = (y[:, 0:1] * w1[0:1, :]
            + y[:, 1:2] * w1[1:2, :]
            + y[:, 2:3] * w1[2:3, :]
            + b1_ref[...])
    h1 = jnp.tanh(pre1)                          # (TB, HPAD) f32

    # Middle layer: bf16 operands, f32 accumulation on the MXU.
    h2 = jnp.tanh(
        jnp.dot(h1.astype(jnp.bfloat16), w2_ref[...],
                preferred_element_type=jnp.float32)
        + b2_ref[...]
    )                                            # (TB, HPAD) f32

    out = jnp.dot(h2.astype(jnp.bfloat16), w3_ref[...],
                  preferred_element_type=jnp.float32) + b3_ref[...]
    o_ref[...] = out.astype(o_ref.dtype)         # (TB, OPAD): 32 B/row to HBM


def prepare_params(params, hidden_size):
    """Zero-pad parameters to lane-aligned shapes; W2/W3 pre-cast to bf16.

    Input params use the (in_features, out_features) layout (transposed
    relative to PyTorch's nn.Linear weight) with (1, out_features) biases.
    """
    w1, b1, w2, b2, w3, b3 = params
    # Guard against accidentally feeding raw PyTorch (out, in) weights.
    assert w1.shape == (3, hidden_size) and b1.shape == (1, hidden_size)
    assert w2.shape == (hidden_size, hidden_size) and b2.shape == (1, hidden_size)
    assert w3.shape == (hidden_size, 3) and b3.shape == (1, 3)

    f32, bf16 = jnp.float32, jnp.bfloat16
    w1p = jnp.zeros((3, HPAD), f32).at[:, :hidden_size].set(w1.astype(f32))
    b1p = jnp.zeros((1, HPAD), f32).at[:, :hidden_size].set(b1.astype(f32))
    w2p = jnp.zeros((HPAD, HPAD), bf16).at[:hidden_size, :hidden_size].set(w2.astype(bf16))
    b2p = jnp.zeros((1, HPAD), f32).at[:, :hidden_size].set(b2.astype(f32))
    w3p = jnp.zeros((HPAD, OPAD), bf16).at[:hidden_size, :3].set(w3.astype(bf16))
    b3p = jnp.zeros((1, OPAD), f32).at[:, :3].set(b3.astype(f32))
    return (w1p, b1p, w2p, b2p, w3p, b3p)


def _pick_batch_tile(batch, block_batch):
    """Largest batch tile <= block_batch that keeps padding waste small."""
    if batch <= block_batch:
        return _round_up(batch, 8)
    candidates = [c for c in (256, 512, 1024, 2048, 4096, 8192) if c <= block_batch]
    if not candidates:
        candidates = [_round_up(block_batch, 8)]
    # Minimize padded rows; break ties toward the bigger tile (fewer steps).
    return min(candidates, key=lambda c: (_round_up(batch, c) - batch, -c))


@functools.partial(jax.jit, static_argnames=("block_batch",))
def lorenz_mlp_forward(t, y, padded_params, block_batch=2048):
    """Pallas equivalent of LorenzMLP.forward(t, y) -> fc(y).  `t` is unused."""
    del t  # matches the PyTorch module: t is accepted but ignored
    w1, b1, w2, b2, w3, b3 = padded_params
    batch = y.shape[0]

    tb = _pick_batch_tile(batch, block_batch)
    pb = _round_up(batch, tb)
    if pb != batch:
        y = jnp.pad(y, ((0, pb - batch), (0, 0)))

    resident = lambda i: (0, 0)  # weights/biases: same block every grid step

    out = pl.pallas_call(
        lorenz_mlp_kernel,
        out_shape=jax.ShapeDtypeStruct((pb, OPAD), y.dtype),
        grid=(pb // tb,),
        in_specs=[
            pl.BlockSpec((tb, 3), lambda i: (i, 0)),   # y tile streams per step
            pl.BlockSpec((3, HPAD), resident),
            pl.BlockSpec((1, HPAD), resident),
            pl.BlockSpec((HPAD, HPAD), resident),
            pl.BlockSpec((1, HPAD), resident),
            pl.BlockSpec((HPAD, OPAD), resident),
            pl.BlockSpec((1, OPAD), resident),
        ],
        out_specs=pl.BlockSpec((tb, OPAD), lambda i: (i, 0)),
        compiler_params=pltpu.CompilerParams(
            # Batch axis is independent.  (On v7x, switch to CORE_PARALLEL /
            # pl.core_map to shard grid steps across the two TensorCores.)
            dimension_semantics=("parallel",),
            # Explicit VMEM budget: ~8 MiB footprint at TB=2048 fits easily;
            # 48 MiB keeps headroom while staying under v7x's 64 MiB physical.
            vmem_limit_bytes=48 * 1024 * 1024,
        ),
    )(y, w1, b1, w2, b2, w3, b3)

    # Layout plumbing: drop batch padding and the 5 zero output lanes.
    return out[:batch, :3]


def init_params(key, hidden_size=50, dtype=jnp.float32):
    """Deterministic synthetic parameters with the shapes nn.Linear implies.

    PyTorch nn.Linear(i, o) has weight (o, i) and bias (o,).  We store the
    weight transposed as (i, o) and the bias as (1, o).
    """
    k1, k2, k3, k4, k5, k6 = jax.random.split(key, 6)

    def uniform(k, shape, fan_in):
        bound = 1.0 / jnp.sqrt(fan_in)
        return jax.random.uniform(k, shape, dtype, minval=-bound, maxval=bound)

    w1 = uniform(k1, (3, hidden_size), 3)
    b1 = uniform(k2, (1, hidden_size), 3)
    w2 = uniform(k3, (hidden_size, hidden_size), hidden_size)
    b2 = uniform(k4, (1, hidden_size), hidden_size)
    w3 = uniform(k5, (hidden_size, 3), hidden_size)
    b3 = uniform(k6, (1, 3), hidden_size)
    return (w1, b1, w2, b2, w3, b3)


def reference_forward(t, y, params):
    del t
    w1, b1, w2, b2, w3, b3 = params
    h1 = jnp.tanh(y @ w1 + b1)
    h2 = jnp.tanh(h1 @ w2 + b2)
    return h2 @ w3 + b3


if __name__ == "__main__":
    key = jax.random.PRNGKey(0)
    k_params, k_y1, k_y2 = jax.random.split(key, 3)

    hidden_size = 50
    raw_params = init_params(k_params, hidden_size=hidden_size)
    padded_params = prepare_params(raw_params, hidden_size)
    t = jnp.float32(0.0)  # unused, mirrors forward(t, y) signature

    # Small single-tile case (batch=8).
    y_small = jax.random.normal(k_y1, (8, 3), dtype=jnp.float32)
    out_small = jax.block_until_ready(lorenz_mlp_forward(t, y_small, padded_params))
    ref_small = reference_forward(t, y_small, raw_params)
    assert out_small.shape == (8, 3)
    # Tolerance loosened because W2/W3 matmuls run with bf16 operands.
    assert jnp.allclose(out_small, ref_small, atol=5e-2, rtol=5e-2)

    # Multi-tile + batch-padding case (batch=300, forced tile=128 -> grid=(3,)).
    y_big = jax.random.normal(k_y2, (300, 3), dtype=jnp.float32)
    out_big = jax.block_until_ready(
        lorenz_mlp_forward(t, y_big, padded_params, block_batch=128))
    ref_big = reference_forward(t, y_big, raw_params)
    assert out_big.shape == (300, 3)
    assert jnp.allclose(out_big, ref_big, atol=5e-2, rtol=5e-2)

    print("KERNEL_OK")
</pallas_src>

<mosaic_0001>
module attributes {stable_mosaic.version = 11 : i64} {
  func.func @lorenz_mlp_kernel(%arg0: i32, %arg1: memref<8x3xf32, #tpu.memory_space<vmem>>, %arg2: memref<3x128xf32, #tpu.memory_space<vmem>>, %arg3: memref<1x128xf32, #tpu.memory_space<vmem>>, %arg4: memref<128x128xbf16, #tpu.memory_space<vmem>>, %arg5: memref<1x128xf32, #tpu.memory_space<vmem>>, %arg6: memref<128x8xbf16, #tpu.memory_space<vmem>>, %arg7: memref<1x8xf32, #tpu.memory_space<vmem>>, %arg8: memref<8x8xf32, #tpu.memory_space<vmem>>) attributes {dimension_semantics = [#tpu.dimension_semantics<parallel>], iteration_bounds = array<i64: 1>, scalar_prefetch = 0 : i64, scratch_operands = 0 : i64, tpu.core_type = #tpu.core_type<tc>, window_params = [{transform_indices = @transform_0, window_bounds = array<i64: 8, 3>}, {pipeline_mode = #tpu.pipeline_mode<synchronous>, transform_indices = @transform_1, window_bounds = array<i64: 3, 128>}, {pipeline_mode = #tpu.pipeline_mode<synchronous>, transform_indices = @transform_2, window_bounds = array<i64: 1, 128>}, {pipeline_mode = #tpu.pipeline_mode<synchronous>, transform_indices = @transform_3, window_bounds = array<i64: 128, 128>}, {pipeline_mode = #tpu.pipeline_mode<synchronous>, transform_indices = @transform_4, window_bounds = array<i64: 1, 128>}, {pipeline_mode = #tpu.pipeline_mode<synchronous>, transform_indices = @transform_5, window_bounds = array<i64: 128, 8>}, {pipeline_mode = #tpu.pipeline_mode<synchronous>, transform_indices = @transform_6, window_bounds = array<i64: 1, 8>}, {transform_indices = @transform_7, window_bounds = array<i64: 8, 8>}]} {
    %c0 = arith.constant 0 : index
    %c0_0 = arith.constant 0 : index
    %0 = vector.load %arg1[%c0, %c0_0] : memref<8x3xf32, #tpu.memory_space<vmem>>, vector<8x3xf32>
    %c0_1 = arith.constant 0 : index
    %c0_2 = arith.constant 0 : index
    %1 = vector.load %arg2[%c0_1, %c0_2] : memref<3x128xf32, #tpu.memory_space<vmem>>, vector<3x128xf32>
    %2 = vector.extract_strided_slice %0 {offsets = [0, 0], sizes = [8, 1], strides = [1, 1]} : vector<8x3xf32> to vector<8x1xf32>
    %3 = vector.extract_strided_slice %1 {offsets = [0, 0], sizes = [1, 128], strides = [1, 1]} : vector<3x128xf32> to vector<1x128xf32>
    %4 = vector.broadcast %2 : vector<8x1xf32> to vector<8x128xf32>
    %5 = vector.broadcast %3 : vector<1x128xf32> to vector<8x128xf32>
    %6 = arith.mulf %4, %5 : vector<8x128xf32>
    %7 = vector.extract_strided_slice %0 {offsets = [0, 1], sizes = [8, 1], strides = [1, 1]} : vector<8x3xf32> to vector<8x1xf32>
    %8 = vector.extract_strided_slice %1 {offsets = [1, 0], sizes = [1, 128], strides = [1, 1]} : vector<3x128xf32> to vector<1x128xf32>
    %9 = vector.broadcast %7 : vector<8x1xf32> to vector<8x128xf32>
    %10 = vector.broadcast %8 : vector<1x128xf32> to vector<8x128xf32>
    %11 = arith.mulf %9, %10 : vector<8x128xf32>
    %12 = arith.addf %6, %11 : vector<8x128xf32>
    %13 = vector.extract_strided_slice %0 {offsets = [0, 2], sizes = [8, 1], strides = [1, 1]} : vector<8x3xf32> to vector<8x1xf32>
    %14 = vector.extract_strided_slice %1 {offsets = [2, 0], sizes = [1, 128], strides = [1, 1]} : vector<3x128xf32> to vector<1x128xf32>
    %15 = vector.broadcast %13 : vector<8x1xf32> to vector<8x128xf32>
    %16 = vector.broadcast %14 : vector<1x128xf32> to vector<8x128xf32>
    %17 = arith.mulf %15, %16 : vector<8x128xf32>
    %18 = arith.addf %12, %17 : vector<8x128xf32>
    %c0_3 = arith.constant 0 : index
    %c0_4 = arith.constant 0 : index
    %19 = vector.load %arg3[%c0_3, %c0_4] : memref<1x128xf32, #tpu.memory_space<vmem>>, vector<1x128xf32>
    %20 = vector.broadcast %19 : vector<1x128xf32> to vector<8x128xf32>
    %21 = arith.addf %18, %20 : vector<8x128xf32>
    %22 = math.tanh %21 : vector<8x128xf32>
    %23 = arith.truncf %22 : vector<8x128xf32> to vector<8x128xbf16>
    %c0_5 = arith.constant 0 : index
    %c0_6 = arith.constant 0 : index
    %24 = vector.load %arg4[%c0_5, %c0_6] : memref<128x128xbf16, #tpu.memory_space<vmem>>, vector<128x128xbf16>
    %cst = arith.constant dense<0.000000e+00> : vector<8x128xf32>
    %25 = tpu.matmul %23, %24, %cst {dimension_numbers = #tpu.dot_dimension_numbers<[1], [0], [0], [1], [0, 0, 1, 1], [], []>} : vector<8x128xbf16>, vector<128x128xbf16>, vector<8x128xf32> -> vector<8x128xf32>
    %c0_7 = arith.constant 0 : index
    %c0_8 = arith.constant 0 : index
    %26 = vector.load %arg5[%c0_7, %c0_8] : memref<1x128xf32, #tpu.memory_space<vmem>>, vector<1x128xf32>
    %27 = vector.broadcast %26 : vector<1x128xf32> to vector<8x128xf32>
    %28 = arith.addf %25, %27 : vector<8x128xf32>
    %29 = math.tanh %28 : vector<8x128xf32>
    %30 = arith.truncf %29 : vector<8x128xf32> to vector<8x128xbf16>
    %c0_9 = arith.constant 0 : index
    %c0_10 = arith.constant 0 : index
    %31 = vector.load %arg6[%c0_9, %c0_10] : memref<128x8xbf16, #tpu.memory_space<vmem>>, vector<128x8xbf16>
    %cst_11 = arith.constant dense<0.000000e+00> : vector<8x8xf32>
    %32 = tpu.matmul %30, %31, %cst_11 {dimension_numbers = #tpu.dot_dimension_numbers<[1], [0], [0], [1], [0, 0, 1, 1], [], []>} : vector<8x128xbf16>, vector<128x8xbf16>, vector<8x8xf32> -> vector<8x8xf32>
    %c0_12 = arith.constant 0 : index
    %c0_13 = arith.constant 0 : index
    %33 = vector.load %arg7[%c0_12, %c0_13] : memref<1x8xf32, #tpu.memory_space<vmem>>, vector<1x8xf32>
    %34 = vector.broadcast %33 : vector<1x8xf32> to vector<8x8xf32>
    %35 = arith.addf %32, %34 : vector<8x8xf32>
    %c0_14 = arith.constant 0 : index
    %c0_15 = arith.constant 0 : index
    %36 = vector.load %arg8[%c0_14, %c0_15] : memref<8x8xf32, #tpu.memory_space<vmem>>, vector<8x8xf32>
    tpu.vector_store %arg8[%c0_14, %c0_15], %35 {strides = array<i32>} : memref<8x8xf32, #tpu.memory_space<vmem>>, vector<8x8xf32>,
    return
  }
  func.func @transform_0(%arg0: i32) -> (i32, i32) {
    %c0_i32 = arith.constant 0 : i32
    %c0_i32_0 = arith.constant 0 : i32
    return %arg0, %c0_i32 : i32, i32
  }
  func.func @transform_1(%arg0: i32) -> (i32, i32) {
    %c0_i32 = arith.constant 0 : i32
    %c0_i32_0 = arith.constant 0 : i32
    %c0_i32_1 = arith.constant 0 : i32
    return %c0_i32, %c0_i32_0 : i32, i32
  }
  func.func @transform_2(%arg0: i32) -> (i32, i32) {
    %c0_i32 = arith.constant 0 : i32
    %c0_i32_0 = arith.constant 0 : i32
    %c0_i32_1 = arith.constant 0 : i32
    return %c0_i32, %c0_i32_0 : i32, i32
  }
  func.func @transform_3(%arg0: i32) -> (i32, i32) {
    %c0_i32 = arith.constant 0 : i32
    %c0_i32_0 = arith.constant 0 : i32
    %c0_i32_1 = arith.constant 0 : i32
    return %c0_i32, %c0_i32_0 : i32, i32
  }
  func.func @transform_4(%arg0: i32) -> (i32, i32) {
    %c0_i32 = arith.constant 0 : i32
    %c0_i32_0 = arith.constant 0 : i32
    %c0_i32_1 = arith.constant 0 : i32
    return %c0_i32, %c0_i32_0 : i32, i32
  }
  func.func @transform_5(%arg0: i32) -> (i32, i32) {
    %c0_i32 = arith.constant 0 : i32
    %c0_i32_0 = arith.constant 0 : i32
    %c0_i32_1 = arith.constant 0 : i32
    return %c0_i32, %c0_i32_0 : i32, i32
  }
  func.func @transform_6(%arg0: i32) -> (i32, i32) {
    %c0_i32 = arith.constant 0 : i32
    %c0_i32_0 = arith.constant 0 : i32
    %c0_i32_1 = arith.constant 0 : i32
    return %c0_i32, %c0_i32_0 : i32, i32
  }
  func.func @transform_7(%arg0: i32) -> (i32, i32) {
    %c0_i32 = arith.constant 0 : i32
    %c0_i32_0 = arith.constant 0 : i32
    return %arg0, %c0_i32 : i32, i32
  }
}

</mosaic_0001>

<bundles_post_ra>
// kernel: lorenz_mlp_forward.1
= control target key start
LH: loop header
LB: loop body
LE: loop exit
PB: predicated region body
PF: predicated region fallthrough
CT: control target
= control target key end

     0   :  { %v320_v0 = vmov 0   ;;  %v321_v2 = vmov 2   ;;  %v322_v5 = vmov 1   ;;  %vm220_vm0 = vcmask 64512   ;;  %s429_s0 = inlined_call_operand.vmem [shape: f32[8,3], index: 0, kind: input, shape index: {}]   ;;  %s430_s3 = inlined_call_operand.vmem [shape: bf16[128,128], index: 3, kind: input, shape index: {}]   ;;  %s431_s2 = inlined_call_operand.vmem [shape: f32[1,128], index: 2, kind: input, shape index: {}]   ;;  %s432_s4 = inlined_call_operand.vmem [shape: f32[1,128], index: 4, kind: input, shape index: {}]   ;;  %s433_s5 = inlined_call_operand.vmem [shape: bf16[128,8], index: 5, kind: input, shape index: {}]   ;;  %s434_s1 = inlined_call_operand.vmem [shape: f32[3,128], index: 1, kind: input, shape index: {}]   ;;  %s435_s6 = inlined_call_operand.vmem [shape: f32[1,8], index: 6, kind: input, shape index: {}]   ;;  %s436_s7 = inlined_call_operand.vmem [shape: f32[8,8], index: 7, kind: output, shape index: {}]  }
   0x1   :  { %309 = vset.pattern.permute.xlu0 %v320_v0  ;;  %v26_v1 = vld [vmem:[%s429_s0] sm:$0xff]  ;;  %311 = vset.pattern.permute.xlu1 %v321_v2  ;;  %v297_v3 = vld [vmem:[%s430_s3 + $0x38] sm:$0xff]  ;;  %v296_v4 = vld [vmem:[%s430_s3 + $0x30] sm:$0xff] }
   0x2   :  { %30 = vperm.xlu0 %309, %v26_v1   ;;  %43 = vperm.xlu1 %311, %v26_v1   ;;  %v295_v6 = vld [vmem:[%s430_s3 + $0x28] sm:$0xff]  ;;  %v294_v7 = vld [vmem:[%s430_s3 + $0x20] sm:$0xff]  ;;  %v293_v8 = vld [vmem:[%s430_s3 + $0x18] sm:$0xff] }
   0x3   :  { %124 = vmatpush.bf16.msra.mxu0 %v297_v3  ;;  %v292_v9 = vld [vmem:[%s430_s3 + $0x10] sm:$0xff]  ;;  %v291_v10 = vld [vmem:[%s430_s3 + $0x8] sm:$0xff]  ;;  %v290_v11 = vld [vmem:[%s430_s3] sm:$0xff] }
   0x4   :  { %v305_v12 = vld [vmem:[%s433_s5 + $0x38] sm:$0xff]  ;;  %v304_v13 = vld [vmem:[%s433_s5 + $0x30] sm:$0xff]  ;;  %v303_v15 = vld [vmem:[%s433_s5 + $0x28] sm:$0xff] }
   0x5   :  { %207 = vmatpush.bf16.msra.mxu1 %v305_v12  ;;  %v27_v16 = vld [vmem:[%s434_s1] sm:$0x7]  ;;  %v301_v23 = vld [vmem:[%s433_s5 + $0x18] sm:$0xff]  ;;  %v300_v33 = vld [vmem:[%s433_s5 + $0x10] sm:$0xff] }
   0x6   :  { %v302_v17 = vld [vmem:[%s433_s5 + $0x20] sm:$0xff]  ;;  %v33_v18 = vperm.slane %v27_v16, 0  ;;  %v39_v19 = vperm.slane %v27_v16, 1  ;;  %v46_v20 = vperm.slane %v27_v16, 2  ;;  %v299_v34 = vld [vmem:[%s433_s5 + $0x8] sm:$0xff] }
   0x7   :  { %125 = vmatpush.bf16.msra.mxu0 %v296_v4  ;;  %v313_v28 = vld [vmem:[%s431_s2] ss:$0 sm:$0xff] }
   0x8   :  { %v298_v35 = vld [vmem:[%s433_s5] sm:$0xff] }
   0x9   :  { %208 = vmatpush.bf16.msra.mxu1 %v304_v13  ;;  %v314_v36 = vld [vmem:[%s432_s4] ss:$0 sm:$0xff] }
   0xa   :  { %310 = vset.pattern.permute.xlu0 %v322_v5  ;;  %v315_v42 = vld [vmem:[%s435_s6] ss:$0 sm:$0xff] }
   0xb   :  { %36 = vperm.xlu0 %310, %v26_v1   ;;  %126 = vmatpush.bf16.msra.mxu0 %v295_v6 }
   0xd   :  { %209 = vmatpush.bf16.msra.mxu1 %v303_v15 }
   0xf   :  { %127 = vmatpush.bf16.msra.mxu0 %v294_v7 }
  0x11   :  { %210 = vmatpush.bf16.msra.mxu1 %v302_v17 }
  0x13   :  { %312 = vset.pattern.permute.xlu0 %v321_v2  ;;  %128 = vmatpush.bf16.msra.mxu0 %v293_v8 }
  0x15   :  { %211 = vmatpush.bf16.msra.mxu1 %v301_v23 }
  0x17   :  { %129 = vmatpush.bf16.msra.mxu0 %v292_v9 }
  0x19   :  { %212 = vmatpush.bf16.msra.mxu1 %v300_v33 }
  0x1b   :  { %130 = vmatpush.bf16.msra.mxu0 %v291_v10 }
  0x1d   :  { %213 = vmatpush.bf16.msra.mxu1 %v299_v34 }
  0x1f   :  { %131 = vmatpush.bf16.msra.mxu0 %v290_v11 }
  0x21   :  { %214 = vmatpush.bf16.msra.mxu1 %v298_v35 }
  0x74   :  { %v31_v14 = vpop.permute.xlu0 %30  ;;  %v44_v21 = vpop.permute.xlu1 %43 }
  0x75   :  { %v34_v24 = vmul.f32 %v33_v18, %v31_v14  ;;  %v47_v26 = vmul.f32 %v46_v20, %v44_v21 }
  0x7d   :  { %v37_v22 = vpop.permute.xlu0 %36 }
  0x7e   :  { %v40_v25 = vmul.f32 %v39_v19, %v37_v22 }
  0x80   :  { %v41_v27 = vadd.f32 %v40_v25, %v34_v24 }
  0x82   :  { %v48_v29 = vadd.f32 %v47_v26, %v41_v27 }
  0x84   :  { %v53_v30 = vadd.f32 %v313_v28, %v48_v29 }
  0x86   :  { %316 = vtanh.f32 %v53_v30 }
  0x8c   :  { %v317_v31 = vpop.eup %316 }
  0x8d   :  { %v55_v32 = vpack.c.bf16 %v317_v31, %v317_v31 }
  0x8f   :  { %132 = vmatmul.bf16.vlgmr.msra.gmra.mxu0 %v55_v32 }
 0x10c   :  { %v133_v37 = vpop.f32.mrf.mxu0 }
 0x10d   :  { %v134_v38 = vadd.f32 %v314_v36, %v133_v37 }
 0x10f   :  { %318 = vtanh.f32 %v134_v38 }
 0x114   :  { %v135_v39 = vpop.f32.mrf.mxu0 }
 0x115   :  { %v319_v40 = vpop.eup %318 }
 0x116   :  { %v138_v41 = vpack.c.bf16 %v319_v40, %v319_v40 }
 0x118   :  { %215 = vmatmul.bf16.vlgmr.msra.gmra.mxu1 %v138_v41 }
 0x195   :  { %v216_v43 = vpop.f32.mrf.mxu1 }
 0x196   :  { %v217_v44 = vadd.f32 %v315_v42, %v216_v43 }
 0x198   :  { %221 = vst.msk [vmem:[%s436_s7] sm:$0xff] %vm220_vm0, %v217_v44 }
 0x19d   :  { %v218_v45 = vpop.f32.mrf.mxu1 }

</bundles_post_ra>
